<compile_context>
chip_gen: v7x
topology: tpu7x:2x2x1
jax: 0.10.0
libtpu: 0.0.40
codegen_flags: <defaults>
</compile_context>

<pallas_src>
import math

import jax
import jax.numpy as jnp
from jax import lax
from jax.experimental import pallas as pl
from jax.experimental.pallas import tpu as pltpu

NEG_FILL = float(-jnp.finfo(jnp.float32).max)  # matches torch.finfo(torch.float).max
LANE = 128


def _round_up(x: int, m: int) -> int:
    return ((x + m - 1) // m) * m


def _make_attn_kernel(inv_scale: float, s_actual: int, block_k: int,
                      use_mask: bool, kv_padded: bool):
    def body(q_ref, k_ref, v_ref, mask_ref, o_ref, m_sc, l_sc, acc_sc, qs_sc):
        j = pl.program_id(2)

        @pl.when(j == 0)
        def _():
            m_sc[...] = jnp.full_like(m_sc, NEG_FILL)
            l_sc[...] = jnp.zeros_like(l_sc)
            acc_sc[...] = jnp.zeros_like(acc_sc)
            # The Q tile is resident across the whole KV loop (its index_map
            # ignores j): fold 1/sqrt(d_k) into it once instead of every step.
            qs_sc[...] = q_ref[...] * jnp.asarray(inv_scale, dtype=q_ref.dtype)

        # Q @ K^T with K row-major (contract last dims of both) -> f32 scores (MXU).
        s = lax.dot_general(qs_sc[...], k_ref[...], (((1,), (1,)), ((), ())),
                            preferred_element_type=jnp.float32)      # (tq, tk)

        if use_mask:
            s = jnp.where(mask_ref[...] != 0, NEG_FILL, s)
        if kv_padded:
            # Padded key columns get -inf (not NEG_FILL) so they carry exactly
            # zero softmax weight, even for rows the user fully masked.
            col = j * block_k + lax.broadcasted_iota(jnp.int32, s.shape, 1)
            s = jnp.where(col < s_actual, s, -jnp.inf)

        # Online softmax (m/l lane-replicated for a friendly layout; with
        # block_k >= 512 this bookkeeping is a small fraction of the p-exp).
        m_prev = m_sc[...]                                           # (tq, 128)
        l_prev = l_sc[...]                                           # (tq, 128)
        s_max = jnp.max(s, axis=-1, keepdims=True)                   # (tq, 1)
        m_new = jnp.maximum(m_prev, s_max)                           # (tq, 128)
        alpha = jnp.exp(m_prev - m_new)                              # (tq, 128)
        p = jnp.exp(s - m_new[:, :1])                                # (tq, tk) f32

        l_sc[...] = alpha * l_prev + jnp.sum(p, axis=-1, keepdims=True)
        m_sc[...] = m_new

        pv = jnp.dot(p.astype(v_ref.dtype), v_ref[...],
                     preferred_element_type=jnp.float32)             # (tq, dv)
        acc_sc[...] = alpha[:, :1] * acc_sc[...] + pv

        @pl.when(j == pl.num_programs(2) - 1)
        def _():
            # Exact divide: runs once per Q tile, keeps parity with the f32 ref.
            l = l_sc[...]
            o_ref[...] = (acc_sc[...] / l[:, :1]).astype(o_ref.dtype)

    if use_mask:
        def kernel(q_ref, k_ref, v_ref, mask_ref, o_ref, m_sc, l_sc, acc_sc, qs_sc):
            body(q_ref, k_ref, v_ref, mask_ref, o_ref, m_sc, l_sc, acc_sc, qs_sc)
    else:
        def kernel(q_ref, k_ref, v_ref, o_ref, m_sc, l_sc, acc_sc, qs_sc):
            body(q_ref, k_ref, v_ref, None, o_ref, m_sc, l_sc, acc_sc, qs_sc)

    return kernel


def scaled_dot_product_attention(Q, K, V, mask=None, *, d_k=None,
                                 block_q=512, block_k=512,
                                 use_bf16_matmul=False):
    """Pallas TPU implementation of ScaledDotProductAttention.forward.

    Q, K: [B, S, d_k]; V: [B, S, d_v]; mask (optional): [B, S, S], truthy = masked.
    Returns [B, S, d_v] with Q's dtype.
    """
    B, S, Dk = Q.shape
    Dv = V.shape[-1]
    out_dtype = Q.dtype
    if d_k is None:
        d_k = Dk
    use_mask = mask is not None

    # ---- tile sizing -------------------------------------------------------
    block_q = max(8, _round_up(block_q, 8))
    block_k = max(LANE, _round_up(block_k, LANE))
    block_q = min(block_q, _round_up(S, 8))        # never tile past the sequence
    block_k = min(block_k, _round_up(S, LANE))
    # v7x has 2 TensorCores; keep >= 2 cells on the "parallel" grid axes when
    # the sequence allows it (no effect on v5e/v6e, which have a single TC).
    while B * ((S + block_q - 1) // block_q) < 2 and block_q >= 64:
        block_q = max(32, (block_q // 2) // 32 * 32)

    s_pad_q = _round_up(S, block_q)
    s_pad_k = _round_up(S, block_k)
    dk_pad = _round_up(Dk, LANE)
    dv_pad = _round_up(Dv, LANE)
    kv_padded = s_pad_k > S

    if use_bf16_matmul and Q.dtype == jnp.float32:
        # Optional: halve Q/K/V HBM traffic and run the MXU at bf16 rates.
        # (Changes numerics vs. the f32 reference -> off by default.)
        Q, K, V = (Q.astype(jnp.bfloat16), K.astype(jnp.bfloat16),
                   V.astype(jnp.bfloat16))

    Qp = jnp.pad(Q, ((0, 0), (0, s_pad_q - S), (0, dk_pad - Dk)))
    Kp = jnp.pad(K, ((0, 0), (0, s_pad_k - S), (0, dk_pad - Dk)))
    Vp = jnp.pad(V, ((0, 0), (0, s_pad_k - S), (0, dv_pad - Dv)))

    in_specs = [
        pl.BlockSpec((None, block_q, dk_pad), lambda b, i, j: (b, i, 0)),  # Q
        pl.BlockSpec((None, block_k, dk_pad), lambda b, i, j: (b, j, 0)),  # K
        pl.BlockSpec((None, block_k, dv_pad), lambda b, i, j: (b, j, 0)),  # V
    ]
    inputs = [Qp, Kp, Vp]
    if use_mask:
        Mp = jnp.pad(mask.astype(jnp.int8),
                     ((0, 0), (0, s_pad_q - S), (0, s_pad_k - S)))
        in_specs.append(
            pl.BlockSpec((None, block_q, block_k), lambda b, i, j: (b, i, j)))
        inputs.append(Mp)

    kernel = _make_attn_kernel(1.0 / math.sqrt(d_k), S, block_k, use_mask,
                               kv_padded)

    out = pl.pallas_call(
        kernel,
        out_shape=jax.ShapeDtypeStruct((B, s_pad_q, dv_pad), out_dtype),
        grid_spec=pltpu.PrefetchScalarGridSpec(
            num_scalar_prefetch=0,
            grid=(B, s_pad_q // block_q, s_pad_k // block_k),
            in_specs=in_specs,
            out_specs=pl.BlockSpec((None, block_q, dv_pad),
                                   lambda b, i, j: (b, i, 0)),
            scratch_shapes=[
                pltpu.VMEM((block_q, LANE), jnp.float32),     # running max m
                pltpu.VMEM((block_q, LANE), jnp.float32),     # running denom l
                pltpu.VMEM((block_q, dv_pad), jnp.float32),   # running numerator
                pltpu.VMEM((block_q, dk_pad), Qp.dtype),      # pre-scaled Q tile
            ],
        ),
        compiler_params=pltpu.CompilerParams(
            dimension_semantics=("parallel", "parallel", "arbitrary"),
            vmem_limit_bytes=32 * 1024 * 1024,  # footprint ~few MiB; safe on v7x
        ),
    )(*inputs)

    return out[:, :S, :Dv]


def _reference(Q, K, V, mask=None, *, d_k):
    scores = jnp.einsum("bsd,btd->bst", Q, K) / jnp.sqrt(jnp.float32(d_k))
    if mask is not None:
        scores = jnp.where(mask, NEG_FILL, scores)
    w = jax.nn.softmax(scores, axis=2)
    return jnp.einsum("bst,btd->bsd", w, V)


if __name__ == "__main__":
    key = jax.random.PRNGKey(0)
    kq, kk, kv, km = jax.random.split(key, 4)

    B, S, d_k, d_v = 2, 8, 32, 32
    Q = jax.random.normal(kq, (B, S, d_k), dtype=jnp.float32)
    K = jax.random.normal(kk, (B, S, d_k), dtype=jnp.float32)
    V = jax.random.normal(kv, (B, S, d_v), dtype=jnp.float32)

    TOL = 1e-3

    # No-mask path.
    out = jax.block_until_ready(scaled_dot_product_attention(Q, K, V, d_k=d_k))
    ref = _reference(Q, K, V, d_k=d_k)
    assert out.shape == ref.shape
    assert jnp.allclose(out, ref, atol=TOL, rtol=TOL), "no-mask mismatch"

    # Masked path (True = fill with -finfo.max before softmax).
    mask = jax.random.bernoulli(km, p=0.25, shape=(B, S, S))
    out_m = jax.block_until_ready(
        scaled_dot_product_attention(Q, K, V, mask, d_k=d_k))
    ref_m = _reference(Q, K, V, mask, d_k=d_k)
    assert jnp.allclose(out_m, ref_m, atol=TOL, rtol=TOL), "masked mismatch"

    # Fully-masked-row edge case: torch's -finfo.max fill gives a uniform
    # distribution over the S real keys; padded key columns must not leak in.
    mask_full = mask.at[:, 0, :].set(True)
    out_f = jax.block_until_ready(
        scaled_dot_product_attention(Q, K, V, mask_full, d_k=d_k))
    ref_f = _reference(Q, K, V, mask_full, d_k=d_k)
    assert jnp.allclose(out_f, ref_f, atol=TOL, rtol=TOL), "fully-masked mismatch"

    print("KERNEL_OK")
</pallas_src>

<mosaic_0001>
module attributes {stable_mosaic.version = 11 : i64} {
  func.func @kernel(%arg0: i32, %arg1: i32, %arg2: i32, %arg3: memref<1x8x128xf32, #tpu.memory_space<vmem>>, %arg4: memref<1x128x128xf32, #tpu.memory_space<vmem>>, %arg5: memref<1x128x128xf32, #tpu.memory_space<vmem>>, %arg6: memref<1x8x128xf32, #tpu.memory_space<vmem>>, %arg7: memref<8x128xf32, #tpu.memory_space<vmem>>, %arg8: memref<8x128xf32, #tpu.memory_space<vmem>>, %arg9: memref<8x128xf32, #tpu.memory_space<vmem>>, %arg10: memref<8x128xf32, #tpu.memory_space<vmem>>) attributes {dimension_semantics = [#tpu.dimension_semantics<parallel>, #tpu.dimension_semantics<parallel>, #tpu.dimension_semantics<arbitrary>], iteration_bounds = array<i64: 2, 1, 1>, scalar_prefetch = 0 : i64, scratch_operands = 4 : i64, tpu.core_type = #tpu.core_type<tc>, window_params = [{transform_indices = @transform_0, window_bounds = array<i64: 1, 8, 128>}, {transform_indices = @transform_1, window_bounds = array<i64: 1, 128, 128>}, {transform_indices = @transform_2, window_bounds = array<i64: 1, 128, 128>}, {transform_indices = @transform_3, window_bounds = array<i64: 1, 8, 128>}]} {
    %c0_i32 = arith.constant 0 : i32
    %0 = arith.cmpi eq, %arg2, %c0_i32 : i32
    %1 = arith.extui %0 : i1 to i32
    %c0_i32_0 = arith.constant 0 : i32
    %2 = arith.cmpi ne, %1, %c0_i32_0 : i32
    scf.if %2 {
      %cst_26 = arith.constant -3.40282347E+38 : f32
      %46 = vector.broadcast %cst_26 : f32 to vector<8x128xf32>
      %c0_27 = arith.constant 0 : index
      %c0_28 = arith.constant 0 : index
      %47 = vector.load %arg7[%c0_27, %c0_28] : memref<8x128xf32, #tpu.memory_space<vmem>>, vector<8x128xf32>
      tpu.vector_store %arg7[%c0_27, %c0_28], %46 {strides = array<i32>} : memref<8x128xf32, #tpu.memory_space<vmem>>, vector<8x128xf32>,
      %cst_29 = arith.constant 0.000000e+00 : f32
      %48 = vector.broadcast %cst_29 : f32 to vector<8x128xf32>
      %c0_30 = arith.constant 0 : index
      %c0_31 = arith.constant 0 : index
      %49 = vector.load %arg8[%c0_30, %c0_31] : memref<8x128xf32, #tpu.memory_space<vmem>>, vector<8x128xf32>
      tpu.vector_store %arg8[%c0_30, %c0_31], %48 {strides = array<i32>} : memref<8x128xf32, #tpu.memory_space<vmem>>, vector<8x128xf32>,
      %cst_32 = arith.constant 0.000000e+00 : f32
      %50 = vector.broadcast %cst_32 : f32 to vector<8x128xf32>
      %c0_33 = arith.constant 0 : index
      %c0_34 = arith.constant 0 : index
      %51 = vector.load %arg9[%c0_33, %c0_34] : memref<8x128xf32, #tpu.memory_space<vmem>>, vector<8x128xf32>
      tpu.vector_store %arg9[%c0_33, %c0_34], %50 {strides = array<i32>} : memref<8x128xf32, #tpu.memory_space<vmem>>, vector<8x128xf32>,
      %c0_35 = arith.constant 0 : index
      %c0_36 = arith.constant 0 : index
      %c0_37 = arith.constant 0 : index
      %52 = vector.load %arg3[%c0_35, %c0_36, %c0_37] : memref<1x8x128xf32, #tpu.memory_space<vmem>>, vector<1x8x128xf32>
      %53 = vector.shape_cast %52 : vector<1x8x128xf32> to vector<8x128xf32>
      %cst_38 = arith.constant 0.176776692 : f32
      %54 = vector.broadcast %cst_38 : f32 to vector<8x128xf32>
      %55 = arith.mulf %53, %54 : vector<8x128xf32>
      %c0_39 = arith.constant 0 : index
      %c0_40 = arith.constant 0 : index
      %56 = vector.load %arg10[%c0_39, %c0_40] : memref<8x128xf32, #tpu.memory_space<vmem>>, vector<8x128xf32>
      tpu.vector_store %arg10[%c0_39, %c0_40], %55 {strides = array<i32>} : memref<8x128xf32, #tpu.memory_space<vmem>>, vector<8x128xf32>,
    } else {
    }
    %c0 = arith.constant 0 : index
    %c0_1 = arith.constant 0 : index
    %3 = vector.load %arg10[%c0, %c0_1] : memref<8x128xf32, #tpu.memory_space<vmem>>, vector<8x128xf32>
    %c0_2 = arith.constant 0 : index
    %c0_3 = arith.constant 0 : index
    %c0_4 = arith.constant 0 : index
    %4 = vector.load %arg4[%c0_2, %c0_3, %c0_4] : memref<1x128x128xf32, #tpu.memory_space<vmem>>, vector<1x128x128xf32>
    %5 = vector.shape_cast %4 : vector<1x128x128xf32> to vector<128x128xf32>
    %cst = arith.constant dense<0.000000e+00> : vector<8x128xf32>
    %6 = tpu.matmul %3, %5, %cst {dimension_numbers = #tpu.dot_dimension_numbers<[1], [1], [0], [0], [0, 0, 1, 0], [], []>} : vector<8x128xf32>, vector<128x128xf32>, vector<8x128xf32> -> vector<8x128xf32>
    %c128_i32 = arith.constant 128 : i32
    %7 = arith.muli %arg2, %c128_i32 : i32
    %8 = tpu.iota {dimensions = array<i32: 1>} : vector<8x128xi32>
    %9 = vector.broadcast %7 : i32 to vector<8x128xi32>
    %10 = arith.addi %9, %8 : vector<8x128xi32>
    %c8_i32 = arith.constant 8 : i32
    %11 = vector.broadcast %c8_i32 : i32 to vector<8x128xi32>
    %12 = arith.cmpi slt, %10, %11 : vector<8x128xi32>
    %cst_5 = arith.constant 0xFF800000 : f32
    %13 = vector.broadcast %cst_5 : f32 to vector<8x128xf32>
    %14 = arith.select %12, %6, %13 : vector<8x128xi1>, vector<8x128xf32>
    %c0_6 = arith.constant 0 : index
    %c0_7 = arith.constant 0 : index
    %15 = vector.load %arg7[%c0_6, %c0_7] : memref<8x128xf32, #tpu.memory_space<vmem>>, vector<8x128xf32>
    %c0_8 = arith.constant 0 : index
    %c0_9 = arith.constant 0 : index
    %16 = vector.load %arg8[%c0_8, %c0_9] : memref<8x128xf32, #tpu.memory_space<vmem>>, vector<8x128xf32>
    %cst_10 = arith.constant dense<0xFF800000> : vector<8xf32>
    %17 = vector.multi_reduction <maximumf>, %14, %cst_10 [1] : vector<8x128xf32> to vector<8xf32>
    %18 = vector.shape_cast %17 : vector<8xf32> to vector<8x1xf32>
    %19 = vector.broadcast %18 : vector<8x1xf32> to vector<8x128xf32>
    %20 = arith.maximumf %15, %19 : vector<8x128xf32>
    %21 = arith.subf %15, %20 : vector<8x128xf32>
    %22 = math.exp %21 : vector<8x128xf32>
    %23 = vector.extract_strided_slice %20 {offsets = [0, 0], sizes = [8, 1], strides = [1, 1]} : vector<8x128xf32> to vector<8x1xf32>
    %24 = vector.broadcast %23 : vector<8x1xf32> to vector<8x128xf32>
    %25 = arith.subf %14, %24 : vector<8x128xf32>
    %26 = math.exp %25 : vector<8x128xf32>
    %27 = arith.mulf %22, %16 : vector<8x128xf32>
    %cst_11 = arith.constant dense<0.000000e+00> : vector<8xf32>
    %28 = vector.multi_reduction <add>, %26, %cst_11 [1] : vector<8x128xf32> to vector<8xf32>
    %29 = vector.shape_cast %28 : vector<8xf32> to vector<8x1xf32>
    %30 = vector.broadcast %29 : vector<8x1xf32> to vector<8x128xf32>
    %31 = arith.addf %27, %30 : vector<8x128xf32>
    %c0_12 = arith.constant 0 : index
    %c0_13 = arith.constant 0 : index
    %32 = vector.load %arg8[%c0_12, %c0_13] : memref<8x128xf32, #tpu.memory_space<vmem>>, vector<8x128xf32>
    tpu.vector_store %arg8[%c0_12, %c0_13], %31 {strides = array<i32>} : memref<8x128xf32, #tpu.memory_space<vmem>>, vector<8x128xf32>,
    %c0_14 = arith.constant 0 : index
    %c0_15 = arith.constant 0 : index
    %33 = vector.load %arg7[%c0_14, %c0_15] : memref<8x128xf32, #tpu.memory_space<vmem>>, vector<8x128xf32>
    tpu.vector_store %arg7[%c0_14, %c0_15], %20 {strides = array<i32>} : memref<8x128xf32, #tpu.memory_space<vmem>>, vector<8x128xf32>,
    %c0_16 = arith.constant 0 : index
    %c0_17 = arith.constant 0 : index
    %c0_18 = arith.constant 0 : index
    %34 = vector.load %arg5[%c0_16, %c0_17, %c0_18] : memref<1x128x128xf32, #tpu.memory_space<vmem>>, vector<1x128x128xf32>
    %35 = vector.shape_cast %34 : vector<1x128x128xf32> to vector<128x128xf32>
    %cst_19 = arith.constant dense<0.000000e+00> : vector<8x128xf32>
    %36 = tpu.matmul %26, %35, %cst_19 {dimension_numbers = #tpu.dot_dimension_numbers<[1], [0], [0], [1], [0, 0, 1, 1], [], []>} : vector<8x128xf32>, vector<128x128xf32>, vector<8x128xf32> -> vector<8x128xf32>
    %37 = vector.extract_strided_slice %22 {offsets = [0, 0], sizes = [8, 1], strides = [1, 1]} : vector<8x128xf32> to vector<8x1xf32>
    %c0_20 = arith.constant 0 : index
    %c0_21 = arith.constant 0 : index
    %38 = vector.load %arg9[%c0_20, %c0_21] : memref<8x128xf32, #tpu.memory_space<vmem>>, vector<8x128xf32>
    %39 = vector.broadcast %37 : vector<8x1xf32> to vector<8x128xf32>
    %40 = arith.mulf %39, %38 : vector<8x128xf32>
    %41 = arith.addf %40, %36 : vector<8x128xf32>
    %c0_22 = arith.constant 0 : index
    %c0_23 = arith.constant 0 : index
    %42 = vector.load %arg9[%c0_22, %c0_23] : memref<8x128xf32, #tpu.memory_space<vmem>>, vector<8x128xf32>
    tpu.vector_store %arg9[%c0_22, %c0_23], %41 {strides = array<i32>} : memref<8x128xf32, #tpu.memory_space<vmem>>, vector<8x128xf32>,
    %c0_i32_24 = arith.constant 0 : i32
    %43 = arith.cmpi eq, %arg2, %c0_i32_24 : i32
    %44 = arith.extui %43 : i1 to i32
    %c0_i32_25 = arith.constant 0 : i32
    %45 = arith.cmpi ne, %44, %c0_i32_25 : i32
    scf.if %45 {
      %c0_26 = arith.constant 0 : index
      %c0_27 = arith.constant 0 : index
      %46 = vector.load %arg8[%c0_26, %c0_27] : memref<8x128xf32, #tpu.memory_space<vmem>>, vector<8x128xf32>
      %c0_28 = arith.constant 0 : index
      %c0_29 = arith.constant 0 : index
      %47 = vector.load %arg9[%c0_28, %c0_29] : memref<8x128xf32, #tpu.memory_space<vmem>>, vector<8x128xf32>
      %48 = vector.extract_strided_slice %46 {offsets = [0, 0], sizes = [8, 1], strides = [1, 1]} : vector<8x128xf32> to vector<8x1xf32>
      %49 = vector.broadcast %48 : vector<8x1xf32> to vector<8x128xf32>
      %50 = arith.divf %47, %49 : vector<8x128xf32>
      %c0_30 = arith.constant 0 : index
      %c0_31 = arith.constant 0 : index
      %c0_32 = arith.constant 0 : index
      %51 = vector.load %arg6[%c0_30, %c0_31, %c0_32] : memref<1x8x128xf32, #tpu.memory_space<vmem>>, vector<1x8x128xf32>
      %52 = vector.shape_cast %51 : vector<1x8x128xf32> to vector<8x128xf32>
      %53 = vector.shape_cast %50 : vector<8x128xf32> to vector<1x8x128xf32>
      tpu.vector_store %arg6[%c0_30, %c0_31, %c0_32], %53 {strides = array<i32>} : memref<1x8x128xf32, #tpu.memory_space<vmem>>, vector<1x8x128xf32>,
    } else {
    }
    return
  }
  func.func @transform_0(%arg0: i32, %arg1: i32, %arg2: i32) -> (i32, i32, i32) {
    %c0_i32 = arith.constant 0 : i32
    %c0_i32_0 = arith.constant 0 : i32
    return %arg0, %arg1, %c0_i32 : i32, i32, i32
  }
  func.func @transform_1(%arg0: i32, %arg1: i32, %arg2: i32) -> (i32, i32, i32) {
    %c0_i32 = arith.constant 0 : i32
    %c0_i32_0 = arith.constant 0 : i32
    return %arg0, %arg2, %c0_i32 : i32, i32, i32
  }
  func.func @transform_2(%arg0: i32, %arg1: i32, %arg2: i32) -> (i32, i32, i32) {
    %c0_i32 = arith.constant 0 : i32
    %c0_i32_0 = arith.constant 0 : i32
    return %arg0, %arg2, %c0_i32 : i32, i32, i32
  }
  func.func @transform_3(%arg0: i32, %arg1: i32, %arg2: i32) -> (i32, i32, i32) {
    %c0_i32 = arith.constant 0 : i32
    %c0_i32_0 = arith.constant 0 : i32
    return %arg0, %arg1, %c0_i32 : i32, i32, i32
  }
}

</mosaic_0001>

<bundles_post_ra>
// kernel: tpu_custom_call.1
= control target key start
LH: loop header
LB: loop body
LE: loop exit
PB: predicated region body
PF: predicated region fallthrough
CT: control target
= control target key end

     0   :  { %s1471_s0 = inlined_call_operand.hbm [shape: f32[2,8,128], index: 0, kind: input, shape index: {}]   ;;  %s1472_s1 = inlined_call_operand.hbm [shape: f32[2,128,128], index: 1, kind: input, shape index: {}]   ;;  %s1473_s2 = inlined_call_operand.hbm [shape: f32[2,128,128], index: 2, kind: input, shape index: {}]   ;;  %s1474_s3 = inlined_call_operand.hbm [shape: f32[2,8,128], index: 3, kind: output, shape index: {}]  }
   0x1   :  { %1482 = sst [smem:[#allocation19_spill]] %s1472_s1 }
   0x2   :  { %8 = vsyncpa [#allocation7], 0 }
   0x3   :  { %10 = vsyncpa [#allocation7 + $0x1], 0 }
   0x4   :  { %11 = vsyncpa [#allocation10], 0 }
   0x5   :  { %13 = vsyncpa [#allocation10 + $0x1], 0 }
   0x6   :  { %14 = vsyncpa [#allocation8], 0 }
   0x7   :  { %16 = vsyncpa [#allocation8 + $0x1], 0  ;;  %s1147_s12 = smov 0   ;;  %s1149_s13 = smov 0  }
   0x8   :  { %s1151_s14 = smov 0   ;;  %s1153_s15 = smov 0  }
   0x9   :  { %s1155_s16 = smov 0   ;;  %s1157_s17 = smov 0  }
   0xa LB: > { %1483 = sst [smem:[#allocation16_spill]] %s1103_s14  ;;  %s1178_s18 = sadd.s32 4294967295, %s1115_s17   ;;  %s1115_s17 = sphi %s1157_s17, %s22_s17   ;;  %s1111_s16 = sphi %s1155_s16, %s1507_s16   ;;  %s1107_s15 = sphi %s1153_s15, %s1506_s15   ;;  %s1103_s14 = sphi %s1151_s14, %s1502_s14   ;;  %s1099_s13 = sphi %s1149_s13, %s1505_s13   ;;  %s1095_s12 = sphi %s1147_s12, %s1504_s12  }
   0xb   : > { %s679_s19 = sadd.s32 4294967294, %s1115_s17   ;;  %s41_s20 = sadd.s32 1, %s1111_s16 }
   0xc   : > { %s50_s21 = sadd.s32 1, %s1103_s14  ;;  %p43_p0 = scmp.ge.s32.totalorder %s41_s20, 2 }
   0xd   : > { %p57_p1 = scmp.ne.s32.totalorder %s1103_s14, %s1099_s13  ;;  %p58_p2 = scmp.eq.s32.totalorder %s1115_s17, 0 }
   0xe   : > { %p63_p3 = scmp.ne.s32.totalorder %s1099_s13, %s1095_s12  ;;  %s1509_s20 = smov (%p43_p0, %s41_s20), 0 }
   0xf   : > { %1484 = sst [smem:[#allocation17_spill]] %s1509_s20  ;;  %p1190_p4 = por %p58_p2, %p57_p1 }
  0x10   : > { %p64_p5 = scmp.eq.s32.totalorder %s1178_s18, 0  ;;  %s45_s23 = ssub.s32 %s1111_s16, %s1509_s20 }
  0x11   : > { %p145_p6 = scmp.eq.s32.totalorder %s1178_s18, 1  ;;  %p48_p7 = scmp.eq.s32.totalorder %s45_s23, 0 }
  0x12   : > { %p1198_p8 = por %p64_p5, %p63_p3  ;;  %p151_p10 = scmp.eq.s32.totalorder %s679_s19, 1 }
  0x13   : > { %p1202_p9 = por %p145_p6, %p57_p1  ;;  %p875_p13 = scmp.lt.s32.totalorder %s1115_s17, 2 }
  0x14   : > { %s1486_s24 = scalar_select %p1198_p8, 1, 0 }
  0x15   : > { %s1487_s25 = scalar_select %p1202_p9, 1, 0 }
  0x16   : > { %s1207_s26 = scalar_select %p48_p7, %s1103_s14, %s50_s21  }
  0x17   : > { %p1209_p11 = por %p151_p10, %p63_p3  ;;  %s1216_s28 = sand.u32 1, %s1103_s14  }
  0x18   : > { %1488 = sst [smem:[#allocation18_spill]] %s1207_s26  ;;  %s190_s29 = sand.u32 1, %s1115_s17  }
  0x19   : > { %s1489_s27 = scalar_select %p1209_p11, 1, 0 }
  0x1a   : > { %s684_s30 = sshll.u32 %s1216_s28, 7  ;;  %p1222_p0 = pnand %p875_p13, %p1190_p4 }
  0x1b   : > { %s699_s5 = sshll.u32 %s1111_s16, 11  ;;  %s1491_s1 = sld [smem:[#allocation19_spill]] }
  0x1c   : > { %s1490_s4 = scalar_select %p1222_p0, 1, 0 }
  0x1d   : > { %s194_s9 = scalar_lea.vmem [#allocation9], %s684_s30  ;;  %s1238_s11 = scalar_lea.sflag [#allocation10], %s190_s29 }
  0x1e   : > { %s203_s10 = sshll.u32 %s194_s9, 4  ;;  %p1244_p2 = pneg %p1222_p0  ;;  %s1236_s10 = int_to_ptr.vmem [resolvable:$true] %s203_s10 }
  0x21   : > { %s1232_s8 = scalar_lea.hbm %s1491_s1, %s699_s5  ;;  %s944_s6 = scalar_lea.hbm %s1491_s1, 4096 }
  0x22   : > { %s939_s19 = scalar_lea.hbm %s1232_s8, 2048  ;;  %p945_p5 = scmp.lt.u32.totalorder %s1232_s8, %s1491_s1 }
  0x23   : > { %p940_p1 = scmp.ne.s32.totalorder %s1232_s8, %s939_s19  ;;  %p946_p6 = scmp.lt.u32.totalorder %s944_s6, %s939_s19 }
  0x24   : > { %p948_p10 = scmp.lt.u32.totalorder %s939_s19, %s1232_s8 }
  0x25   : > { %p942_p3 = pnand %p1244_p2, %p940_p1  ;;  %p947_p7 = por %p946_p6, %p945_p5 }
  0x27   : > { %p943_p4 = pneg %p942_p3  ;;  %p949_p13 = por %p948_p10, %p947_p7 }
  0x29   : > { %p950_p12 = pnand %p949_p13, %p943_p4 }
  0x2b   : > { %953 = shalt.err (!%p950_p12)
}
  0x2c   : > { %s954_s29 = scalar_lea.vmem %s1236_s10, 2048  ;;  %s1117_s22 = smov [#allocation9]  }
  0x2d   : > { %p955_p1 = scmp.ne.s32.totalorder %s1236_s10, %s954_s29  ;;  %s959_s23 = sshll.u32 %s1117_s22, 4  ;;  %s960_s23 = int_to_ptr.vmem [resolvable:$false] %s959_s23 }
  0x2e   : > { %s961_s7 = scalar_lea.vmem %s960_s23, 4096  ;;  %p962_p9 = scmp.lt.s32.totalorder %s1236_s10, %s960_s23 }
  0x2f   : > { %p957_p3 = pnand %p955_p1, %p1244_p2  ;;  %p963_p8 = scmp.lt.s32.totalorder %s961_s7, %s954_s29 }
  0x31   : > { %p958_p11 = pneg %p957_p3  ;;  %p964_p5 = por %p963_p8, %p962_p9 }
  0x33   : > { %p965_p6 = pnand %p964_p5, %p958_p11 }
  0x35   : > { %968 = shalt.err (!%p965_p6)
}
  0x36   : > { %s1479_s19 = smov 128   ;;  %s1119_s6 = smov 8  }
  0x37   : > { %867 = dma.hbm_to_vmem [thread:$0]  (!%p1222_p0), %s1232_s8, 2048, %s1236_s10, %s1238_s11, %s1479_s19, %s1479_s19, %s1119_s6  }
  0x38   : > { %s1276_s22 = scalar_lea.hbm %s1473_s2, %s699_s5  ;;  %p690_p8 = scmp.ge.s32.totalorder %s1115_s17, 1 }
  0x39   : > { %s217_s23 = scalar_lea.vmem [#allocation11], %s684_s30  ;;  %p234_p9 = scmp.lt.s32.totalorder %s1115_s17, 3 }
  0x3a   : > { %s226_s7 = sshll.u32 %s217_s23, 4  ;;  %s682_s20 = sshll.u32 %s1216_s28, 3  ;;  %s1293_s7 = int_to_ptr.vmem [resolvable:$true] %s226_s7 }
  0x3b   : > { %p1282_p11 = pnand %p690_p8, %p234_p9  ;;  %s683_s26 = sshll.u32 %s1111_s16, 7 }
  0x3c   : > { %s1291_s10 = scalar_lea.hbm %s1471_s0, %s683_s26  ;;  %s175_s30 = scalar_lea.vmem [#allocation6], %s682_s20 }
  0x3d   : > { %s1493_s1 = scalar_select %p1282_p11, 1, 0 }
  0x3e   : > { %s183_s5 = sshll.u32 %s175_s30, 4  ;;  %s172_s9 = scalar_lea.sflag [#allocation7], %s1216_s28  ;;  %s184_s5 = int_to_ptr.vmem [resolvable:$true] %s183_s5 }
  0x3f   : > { %s969_s29 = scalar_lea.hbm %s1291_s10, 128  ;;  %s974_s14 = scalar_lea.hbm %s1471_s0, 256 }
  0x40   : > { %p970_p12 = scmp.ne.s32.totalorder %s1291_s10, %s969_s29  ;;  %p975_p10 = scmp.lt.u32.totalorder %s1291_s10, %s1471_s0 }
  0x41   : > { %p976_p13 = scmp.lt.u32.totalorder %s974_s14, %s969_s29  ;;  %p978_p3 = scmp.lt.u32.totalorder %s969_s29, %s1291_s10 }
  0x42   : > { %p972_p4 = pnand %p970_p12, %p1244_p2 }
  0x43   : > { %p977_p1 = por %p976_p13, %p975_p10 }
  0x44   : > { %p973_p7 = pneg %p972_p4 }
  0x45   : > { %p979_p5 = por %p978_p3, %p977_p1 }
  0x47   : > { %p980_p6 = pnand %p979_p5, %p973_p7 }
  0x49   : > { %983 = shalt.err (!%p980_p6)
}
  0x4a   : > { %s984_s20 = scalar_lea.vmem %s184_s5, 128  ;;  %s1120_s28 = smov [#allocation6]  }
  0x4b   : > { %p985_p8 = scmp.ne.s32.totalorder %s184_s5, %s984_s20  ;;  %s989_s30 = sshll.u32 %s1120_s28, 4  ;;  %s990_s30 = int_to_ptr.vmem [resolvable:$false] %s989_s30 }
  0x4c   : > { %s991_s19 = scalar_lea.vmem %s990_s30, 256  ;;  %p992_p4 = scmp.lt.s32.totalorder %s184_s5, %s990_s30 }
  0x4d   : > { %p987_p9 = pnand %p985_p8, %p1244_p2  ;;  %p993_p11 = scmp.lt.s32.totalorder %s991_s19, %s984_s20 }
  0x4f   : > { %p988_p12 = pneg %p987_p9  ;;  %p994_p0 = por %p993_p11, %p992_p4 }
  0x51   : > { %p995_p10 = pnand %p994_p0, %p988_p12 }
  0x53   : > { %998 = shalt.err (!%p995_p10)
}
  0x54   : > { %p1494_p13 = scmp.ne.s32.totalorder %s1490_s4, 0  ;;  %s999_s29 = scalar_lea.hbm %s1276_s22, 2048 }
  0x55   : > { %p1000_p7 = scmp.ne.s32.totalorder %s1276_s22, %s999_s29  ;;  %s1004_s26 = scalar_lea.hbm %s1473_s2, 4096 }
  0x56   : > { %864 = dma.hbm_to_vmem [thread:$0]  (!%p1494_p13), %s1291_s10, 128, %s184_s5, %s172_s9  }
  0x57   : > { %p1002_p1 = pnand %p1000_p7, %p1244_p2  ;;  %p1005_p0 = scmp.lt.u32.totalorder %s1276_s22, %s1473_s2 }
  0x58   : > { %p1006_p11 = scmp.lt.u32.totalorder %s1004_s26, %s999_s29  ;;  %p1008_p6 = scmp.lt.u32.totalorder %s999_s29, %s1276_s22 }
  0x59   : > { %p1003_p3 = pneg %p1002_p1 }
  0x5a   : > { %p1007_p5 = por %p1006_p11, %p1005_p0 }
  0x5c   : > { %p1009_p8 = por %p1008_p6, %p1007_p5 }
  0x5e   : > { %p1010_p9 = pnand %p1009_p8, %p1003_p3 }
  0x60   : > { %1013 = shalt.err (!%p1010_p9)
}
  0x61   : > { %s1014_s10 = scalar_lea.vmem %s1293_s7, 2048  ;;  %s1121_s5 = smov [#allocation11]  }
  0x62   : > { %p1015_p12 = scmp.ne.s32.totalorder %s1293_s7, %s1014_s10  ;;  %s1019_s9 = sshll.u32 %s1121_s5, 4  ;;  %s1020_s9 = int_to_ptr.vmem [resolvable:$false] %s1019_s9 }
  0x63   : > { %s1021_s28 = scalar_lea.vmem %s1020_s9, 4096  ;;  %p1022_p7 = scmp.lt.s32.totalorder %s1293_s7, %s1020_s9 }
  0x64   : > { %p1017_p4 = pnand %p1015_p12, %p1244_p2  ;;  %p1023_p1 = scmp.lt.s32.totalorder %s1021_s28, %s1014_s10 }
  0x66   : > { %p1018_p10 = pneg %p1017_p4  ;;  %p1024_p0 = por %p1023_p1, %p1022_p7 }
  0x68   : > { %p1025_p11 = pnand %p1024_p0, %p1018_p10 }
  0x6a   : > { %1028 = shalt.err (!%p1025_p11)
}
  0x6b   : > { %s1495_s30 = smov 128   ;;  %p1496_p2 = scmp.ne.s32.totalorder %s1493_s1, 0 }
  0x6c   : > { %870 = dma.hbm_to_vmem [thread:$0]  (!%p1494_p13), %s1276_s22, 2048, %s1293_s7, %s1238_s11, %s1495_s30, %s1495_s30, %s1119_s6  }
  0x6d   : > { %238 = sbr.rel (%p1496_p2) target bundleno = 985 (0x3d9), region = 32  ;;  %s1341_s21 = sand.u32 (!%p1496_p2), 1, %s1099_s13  }
  0x6e   : > { %s691_s19 = sshll.u32 (!%p1496_p2), %s1341_s21, 3  ;;  %s241_s29 = scalar_lea.sflag (!%p1496_p2), [#allocation7], %s1341_s21 }
  0x6f   : > { %s1347_s4 = scalar_lea.vmem (!%p1496_p2), [#allocation6], %s691_s19  ;;  %p1497_p3 = scmp.ne.s32.totalorder (!%p1496_p2), %s1486_s24, 0 }
  0x74   : > { %1082 = dma.done.wait (%p1497_p3), %s241_s29, 128  }
  0x75   : > { %1084 = vsyncadd (%p1497_p3), %s241_s29, 4294967168  ;;  %s249_s1 = sand.u32 1, %s1178_s18   ;;  %s692_s11 = sshll.u32 %s1341_s21, 7 }
  0x76   : > { %s250_s6 = scalar_lea.sflag [#allocation10], %s249_s1  ;;  %s1357_s22 = scalar_lea.vmem [#allocation9], %s692_s11 }
  0x77   : > { %1086 = dma.done.wait (%p1497_p3), %s250_s6, 4096  }
  0x78   : > { %1088 = vsyncadd (%p1497_p3), %s250_s6, 4294963200  ;;  %v1122_v0 = vmov 0.0|0.0   ;;  %vm1123_vm0 = vmmov 0   ;;  %v1124_v1 = vmov 0.0   ;;  %v308_v2 = vld [vmem:[%s1357_s22] sm:$0xff]  ;;  %v309_v3 = vld [vmem:[%s1357_s22 + $0x8] sm:$0xff]  ;;  %v395_v28 = vlaneseq }
  0x79   : > { %805 = vmatprep.subr.bf16.mxu0 %v1122_v0  ;;  %767 = vmatprep.mubr.msk.f32.mxu0 %vm1123_vm0, %v1124_v1  ;;  %v806_v4 = vpack.c.bf16 %v309_v3, %v308_v2  ;;  %v310_v5 = vld [vmem:[%s1357_s22 + $0x10] sm:$0xff]  ;;  %v311_v6 = vld [vmem:[%s1357_s22 + $0x18] sm:$0xff]  ;;  %v312_v8 = vld [vmem:[%s1357_s22 + $0x20] sm:$0xff]  ;;  %v1125_v33 = vmov 0   ;;  %s1391_s18 = scalar_lea.vmem [#allocation11], %s692_s11  ;;  %s696_s24 = sshll.u32 %s1107_s15, 7 }
  0x7a   : > { %829 = vmatprep.subr.bf16.mxu1 %v1122_v0  ;;  %802 = vmatprep.mubr.msk.f32.mxu1 %vm1123_vm0, %v1124_v1  ;;  %v809_v7 = vpack.c.bf16 %v311_v6, %v310_v5  ;;  %v313_v9 = vld [vmem:[%s1357_s22 + $0x28] sm:$0xff]  ;;  %v314_v11 = vld [vmem:[%s1357_s22 + $0x30] sm:$0xff]  ;;  %v315_v12 = vld [vmem:[%s1357_s22 + $0x38] sm:$0xff]  ;;  %v396_v29 = vand.u32 127, %v395_v28  ;;  %s294_s7 = scalar_lea.vmem [#allocation12], %s691_s19  ;;  %s1422_s8 = scalar_lea.hbm %s1474_s3, %s696_s24 }
  0x7b   : > { %807 = vmatpush3.bf16.xpose.msra.mxu0 %v806_v4  ;;  %v812_v10 = vpack.c.bf16 %v313_v9, %v312_v8  ;;  %v815_v13 = vpack.c.bf16 %v315_v12, %v314_v11  ;;  %v316_v14 = vld [vmem:[%s1357_s22 + $0x40] sm:$0xff]  ;;  %v317_v15 = vld [vmem:[%s1357_s22 + $0x48] sm:$0xff]  ;;  %v318_v17 = vld [vmem:[%s1357_s22 + $0x50] sm:$0xff]  ;;  %931 = vset.pattern.permute.xlu0 %v1125_v33  ;;  %s546_s23 = sshll.u32 %s294_s7, 4  ;;  %s532_s20 = scalar_lea.sflag [#allocation8], %s1341_s21  ;;  %s1424_s23 = int_to_ptr.vmem [resolvable:$true] %s546_s23 }
  0x7c   : > { %808 = vmatprep.subr.bf16.mxu0 %v1122_v0  ;;  %v818_v16 = vpack.c.bf16 %v317_v15, %v316_v14  ;;  %v319_v18 = vld [vmem:[%s1357_s22 + $0x58] sm:$0xff]  ;;  %v320_v20 = vld [vmem:[%s1357_s22 + $0x60] sm:$0xff]  ;;  %v321_v21 = vld [vmem:[%s1357_s22 + $0x68] sm:$0xff]  ;;  %vm399_vm1 = vcmp.lt.s32.totalorder %v396_v29, 8  ;;  %932 = vset.pattern.permute.xlu1 %v1125_v33  ;;  %s1029_s10 = scalar_lea.vmem %s1424_s23, 128  ;;  %p1498_p5 = scmp.ne.s32.totalorder %s1487_s25, 0 }
  0x7d   : > { %v821_v19 = vpack.c.bf16 %v319_v18, %v318_v17  ;;  %v824_v22 = vpack.c.bf16 %v321_v21, %v320_v20  ;;  %v322_v23 = vld [vmem:[%s1357_s22 + $0x70] sm:$0xff]  ;;  %v323_v24 = vld [vmem:[%s1357_s22 + $0x78] sm:$0xff]  ;;  %v423_v34 = vld [vmem:[%s1391_s18] sm:$0xff]  ;;  %p1030_p13 = scmp.ne.s32.totalorder %s1424_s23, %s1029_s10  ;;  %s1126_s15 = smov [#allocation12]  }
  0x7e   : > { %v827_v25 = vpack.c.bf16 %v323_v24, %v322_v23  ;;  %v304_v26 = vld [vmem:[%s1347_s4] sm:$0xff]  ;;  %v424_v35 = vld [vmem:[%s1391_s18 + $0x8] sm:$0xff]  ;;  %v427_v40 = vld [vmem:[%s1391_s18 + $0x20] sm:$0xff]  ;;  %s1033_s5 = sshll.u32 %s1126_s15, 4  ;;  %s1034_s5 = int_to_ptr.vmem [resolvable:$false] %s1033_s5 }
  0x7f   : > { %v305_v27 = vmul.f32 0.17677669, %v304_v26  ;;  %v425_v36 = vld [vmem:[%s1391_s18 + $0x10] sm:$0xff]  ;;  %v830_v37 = vpack.c.bf16 %v424_v35, %v423_v34  ;;  %v426_v38 = vld [vmem:[%s1391_s18 + $0x18] sm:$0xff]  ;;  %v428_v41 = vld [vmem:[%s1391_s18 + $0x28] sm:$0xff]  ;;  %p1031_p6 = pnand %p1030_p13, %p1498_p5  ;;  %s1035_s9 = scalar_lea.vmem %s1034_s5, 256 }
  0x80   : > { %v833_v39 = vpack.c.bf16 %v426_v38, %v425_v36  ;;  %v836_v42 = vpack.c.bf16 %v428_v41, %v427_v40  ;;  %v429_v43 = vld [vmem:[%s1391_s18 + $0x30] sm:$0xff]  ;;  %v430_v44 = vld [vmem:[%s1391_s18 + $0x38] sm:$0xff]  ;;  %v431_v47 = vld [vmem:[%s1391_s18 + $0x40] sm:$0xff]  ;;  %p1036_p9 = scmp.lt.s32.totalorder %s1424_s23, %s1034_s5  ;;  %p1037_p12 = scmp.lt.s32.totalorder %s1035_s9, %s1029_s10 }
  0x81   : > { %831 = vmatpush3.bf16.msra.mxu1 %v830_v37  ;;  %v839_v45 = vpack.c.bf16 %v430_v44, %v429_v43  ;;  %v432_v48 = vld [vmem:[%s1391_s18 + $0x48] sm:$0xff]  ;;  %v433_v51 = vld [vmem:[%s1391_s18 + $0x50] sm:$0xff]  ;;  %v434_v52 = vld [vmem:[%s1391_s18 + $0x58] sm:$0xff]  ;;  %p1032_p8 = pneg %p1031_p6 }
  0x82   : > { %832 = vmatprep.subr.bf16.mxu1 %v1122_v0  ;;  %v842_v50 = vpack.c.bf16 %v432_v48, %v431_v47  ;;  %v845_v53 = vpack.c.bf16 %v434_v52, %v433_v51  ;;  %v435_v54 = vld [vmem:[%s1391_s18 + $0x60] sm:$0xff]  ;;  %v436_v55 = vld [vmem:[%s1391_s18 + $0x68] sm:$0xff]  ;;  %v437_v57 = vld [vmem:[%s1391_s18 + $0x70] sm:$0xff]  ;;  %p1038_p4 = por %p1037_p12, %p1036_p9 }
  0x83   : > { %810 = vmatpush3.bf16.xpose.msra.mxu0 %v809_v7  ;;  %v848_v56 = vpack.c.bf16 %v436_v55, %v435_v54  ;;  %v438_v58 = vld [vmem:[%s1391_s18 + $0x78] sm:$0xff] }
  0x84   : > { %811 = vmatprep.subr.bf16.mxu0 %v1122_v0  ;;  %v851_v59 = vpack.c.bf16 %v438_v58, %v437_v57  ;;  %p1039_p10 = pnand %p1038_p4, %p1032_p8 }
  0x85   : > { %834 = vmatpush3.bf16.msra.mxu1 %v833_v39 }
  0x86   : > { %835 = vmatprep.subr.bf16.mxu1 %v1122_v0 }
  0x89   : > { %837 = vmatpush3.bf16.msra.mxu1 %v836_v42 }
  0x8a   : > { %838 = vmatprep.subr.bf16.mxu1 %v1122_v0 }
  0x8b   : > { %813 = vmatpush3.bf16.xpose.msra.mxu0 %v812_v10 }
  0x8c   : > { %814 = vmatprep.subr.bf16.mxu0 %v1122_v0 }
  0x8d   : > { %840 = vmatpush3.bf16.msra.mxu1 %v839_v45 }
  0x8e   : > { %841 = vmatprep.subr.bf16.mxu1 %v1122_v0 }
  0x91   : > { %843 = vmatpush3.bf16.msra.mxu1 %v842_v50 }
  0x92   : > { %844 = vmatprep.subr.bf16.mxu1 %v1122_v0 }
  0x93   : > { %816 = vmatpush3.bf16.xpose.msra.mxu0 %v815_v13 }
  0x94   : > { %817 = vmatprep.subr.bf16.mxu0 %v1122_v0 }
  0x95   : > { %846 = vmatpush3.bf16.msra.mxu1 %v845_v53 }
  0x96   : > { %847 = vmatprep.subr.bf16.mxu1 %v1122_v0 }
  0x99   : > { %849 = vmatpush3.bf16.msra.mxu1 %v848_v56 }
  0x9a   : > { %850 = vmatprep.subr.bf16.mxu1 %v1122_v0 }
  0x9b   : > { %819 = vmatpush3.bf16.xpose.msra.mxu0 %v818_v16 }
  0x9c   : > { %820 = vmatprep.subr.bf16.mxu0 %v1122_v0 }
  0x9d   : > { %852 = vmatpush3.bf16.msra.mxu1 %v851_v59 }
  0xa3   : > { %822 = vmatpush3.bf16.xpose.msra.mxu0 %v821_v19 }
  0xa4   : > { %823 = vmatprep.subr.bf16.mxu0 %v1122_v0 }
  0xab   : > { %825 = vmatpush3.bf16.xpose.msra.mxu0 %v824_v22 }
  0xac   : > { %826 = vmatprep.subr.bf16.mxu0 %v1122_v0 }
  0xb3   : > { %828 = vmatpush3.bf16.xpose.msra.mxu0 %v827_v25 }
  0xba   : > { %768 = vmatmul.mubr.f32.vlgmr.msra.gmra.mrb[0].mxu0 %v305_v27 }
 0x18d   : > { %v390_v30 = vpop.f32.mrb[0].mxu0 }
 0x18e   : > { %v769_v31 = vpop.f32.mrb[1].mxu0  ;;  %v400_v32 = vsel %vm399_vm1, %v390_v30, -inf }
 0x18f   : > { %403 = vmax.xlane.f32.xlu0 %v400_v32 }
 0x21c   : > { %v404_v46 = vpop.xlane.xlu0 %403 }
 0x21d   : > { %v405_v49 = vmax.f32 %v404_v46, -3.4028235e+38 }
 0x21f   : > { %411 = vperm.xlu0 %931, %v405_v49   ;;  %v406_v1 = vsub.f32 -3.4028235e+38, %v405_v49 }
 0x221   : > { %v407_v2 = vmul.f32 1.442695, %v406_v1 }
 0x29e   : > { %v412_v60 = vpop.permute.xlu0 %411 }
 0x29f   : > { %v414_v61 = vsub.f32 %v400_v32, %v412_v60 }
 0x2a1   : > { %v415_v62 = vmul.f32 1.442695, %v414_v61 }
 0x2a3   : > { %933 = vpow2.f32 %v415_v62 }
 0x2a4   : > { %935 = vpow2.f32 %v407_v2 }
 0x2ad   : > { %v934_v63 = vpop.eup %933 }
 0x2ae   : > { %418 = vadd.xlane.f32.xlu1 %v934_v63  ;;  %803 = vmatmul.mubr.f32.vlgmr.msra.gmra.mrb[0].mxu1 %v934_v63  ;;  %v936_v3 = vpop.eup %935 }
 0x2af   : > { %v417_v4 = vmul.f32 0.0, %v936_v3 }
 0x33b   : > { %v419_v5 = vpop.xlane.xlu1 %418 }
 0x33c   : > { %v420_v6 = vadd.f32 %v419_v5, %v417_v4 }
 0x33e   : > { %525 = vperm.xlu1 %932, %v420_v6  }
 0x342   : > { %512 = vperm.xlu1 %932, %v936_v3  }
 0x381   : > { %v505_v0 = vpop.f32.mrb[0].mxu1 }
 0x382   : > { %v804_v7 = vpop.f32.mrb[1].mxu1 }
 0x3bd   : > { %v526_v8 = vpop.permute.xlu1 %525 }
 0x3be   : > { %937 = vrcp.f32 %v526_v8 }
 0x3c1   : > { %v513_v9 = vpop.permute.xlu1 %512 }
 0x3c2   : > { %v515_v10 = vmul.f32 0.0, %v513_v9 }
 0x3c4   : > { %v516_v11 = vadd.f32 %v515_v10, %v505_v0 }
 0x3c8   : > { %v938_v12 = vpop.eup %937 }
 0x3c9   : > { %v529_v13 = vmul.f32 %v938_v12, %v516_v11 }
 0x3cb   : > { %530 = vst [vmem:[%s294_s7] sm:$0xff] %v529_v13 }
 0x3cc   : > { %1042 = shalt.err (!%p1039_p10)
}
 0x3cd   : > { %s1043_s28 = scalar_lea.hbm %s1422_s8, 128  ;;  %s1047_s19 = scalar_lea.hbm %s1474_s3, 256 }
 0x3ce   : > { %p1044_p7 = scmp.ne.s32.totalorder %s1422_s8, %s1043_s28  ;;  %p1048_p11 = scmp.lt.u32.totalorder %s1422_s8, %s1474_s3 }
 0x3cf   : > { %p1049_p2 = scmp.lt.u32.totalorder %s1047_s19, %s1043_s28  ;;  %p1051_p13 = scmp.lt.u32.totalorder %s1043_s28, %s1422_s8 }
 0x3d0   : > { %p1045_p1 = pnand %p1044_p7, %p1498_p5 }
 0x3d1   : > { %p1050_p3 = por %p1049_p2, %p1048_p11 }
 0x3d2   : > { %p1046_p0 = pneg %p1045_p1 }
 0x3d3   : > { %p1052_p6 = por %p1051_p13, %p1050_p3 }
 0x3d5   : > { %p1053_p8 = pnand %p1052_p6, %p1046_p0 }
 0x3d7   : > { %1056 = shalt.err (!%p1053_p8)
}
 0x3d8   : > { %859 = dma.vmem_to_hbm [thread:$0]  (%p1498_p5), %s1424_s23, 128, %s1422_s8, %s532_s20  }
 0x3d9 PF: > { %s558_s1 = sand.u32 1, %s1095_s12   ;;  %p1499_p9 = scmp.ne.s32.totalorder %s1489_s27, 0 }
 0x3da   : > { %p1500_p12 = scmp.ge.s32.totalorder %s1115_s17, 2  ;;  %s559_s11 = scalar_lea.sflag [#allocation8], %s558_s1 }
 0x3dc   : > { %p872_p4 = pnand %p1500_p12, %p1499_p9 }
 0x3de   : > { %1090 = dma.done.wait (!%p872_p4), %s559_s11, 128  }
 0x3df   : > { %1092 = vsyncadd (!%p872_p4), %s559_s11, 4294967168  ;;  %s22_s17 = sadd.s32 1, %s1115_s17   ;;  %s1501_s6 = sld [smem:[#allocation16_spill]] }
 0x3e0   : > { %p19_p10 = scmp.ge.s32.totalorder %s22_s17, 4   ;;  %s1502_s14 = sld [smem:[#allocation18_spill]] }
 0x3e1   : > { %s1503_s25 = sld [smem:[#allocation17_spill]]  ;;  %s1504_s12 = smov %s1099_s13 }
 0x3e2   : > { %s1506_s15 = smov %s1111_s16  ;;  %21 = sbr.rel (!%p19_p10) target bundleno = 10 (0xa), region = 109 }
 0x3e5   : > { %s1505_s13 = smov %s1501_s6 }
 0x3e7   : > { %s1507_s16 = smov %s1503_s25 }
 0x3e9   :  { %564 = vsyncpa [#allocation7], 1 }
 0x3ea   :  { %566 = vsyncpa [#allocation7 + $0x1], 1 }
 0x3eb   :  { %567 = vsyncpa [#allocation10], 1 }
 0x3ec   :  { %569 = vsyncpa [#allocation10 + $0x1], 1 }
 0x3ed   :  { %570 = vsyncpa [#allocation8], 1 }
 0x3ee   :  { %572 = vsyncpa [#allocation8 + $0x1], 1 }

</bundles_post_ra>
